<compile_context>
chip_gen: v7x
topology: tpu7x:2x2x1
jax: 0.10.0
libtpu: 0.0.40
codegen_flags: <defaults>
</compile_context>

<pallas_src>
import functools

import jax
import jax.numpy as jnp
from jax.experimental import pallas as pl
from jax.experimental.pallas import tpu as pltpu


def _round_up(x, m):
    return (x + m - 1) // m * m


# ----------------------------------------------------------------------------
# Kernel
# ----------------------------------------------------------------------------
def _decoder_kernel(xh_ref, c_ref, w_xh_ref, b_ref, wfc_ref, bfc_ref,
                    pred_ref, hnew_ref, cnew_ref, h_bf16):
    """One vocab tile per grid step; LSTM cell only on the first step."""
    Hp = cnew_ref.shape[-1]

    @pl.when(pl.program_id(0) == 0)
    def _():
        # gates = [emb | h_prev] @ W_xh + (b_ih + b_hh)   -> [Bp, 4*Hp], f32 acc
        gates = (
            jnp.dot(xh_ref[...], w_xh_ref[...],
                    preferred_element_type=jnp.float32)
            + b_ref[...]
        )
        # PyTorch LSTM gate order: input, forget, cell(g), output.
        # Slices land on 128-lane boundaries (Hp is a multiple of 128).
        i_g = jax.nn.sigmoid(gates[:, 0 * Hp:1 * Hp])
        f_g = jax.nn.sigmoid(gates[:, 1 * Hp:2 * Hp])
        g_g = jnp.tanh(gates[:, 2 * Hp:3 * Hp])
        o_g = jax.nn.sigmoid(gates[:, 3 * Hp:4 * Hp])

        c_new = f_g * c_ref[...] + i_g * g_g
        h_new = o_g * jnp.tanh(c_new)

        cnew_ref[...] = c_new
        hnew_ref[...] = h_new
        h_bf16[...] = h_new.astype(jnp.bfloat16)   # reused by every vocab tile

    # prediction tile = h_new @ W_fc[:, j*TN:(j+1)*TN] + b_fc[j*TN:(j+1)*TN]
    pred_ref[...] = (
        jnp.dot(h_bf16[...], wfc_ref[...], preferred_element_type=jnp.float32)
        + bfc_ref[...]
    )


# ----------------------------------------------------------------------------
# Parameter packing (PyTorch layout -> padded, fused, bf16 kernel layout)
# ----------------------------------------------------------------------------
def pack_params(raw, embed_dim, hidden_dim, output_dim, max_tile_n=512):
    E, H, V = embed_dim, hidden_dim, output_dim
    Ep = _round_up(E, 128)
    Hp = _round_up(H, 128)
    Vp = _round_up(V, 128)

    # Lane-dense vocab tile (multiple of 128) that divides the padded vocab.
    TN = 128
    for t in (max_tile_n, 256, 128):
        if t <= Vp and Vp % t == 0:
            TN = t
            break

    w_ih = raw["w_ih"]                       # [4H, E]
    w_hh = raw["w_hh"]                       # [4H, H]
    b = raw["b_ih"] + raw["b_hh"]            # [4H]
    w_fc = raw["w_fc"]                       # [V, H]
    b_fc = raw["b_fc"]                       # [V]

    # Fused, padded input->gates weight: [(Ep + Hp), 4*Hp].
    # Rows [0:E) take W_ih^T, rows [Ep:Ep+H) take W_hh^T; gate k occupies
    # columns [k*Hp : k*Hp + H). All padding is zero -> padded h/c stay 0.
    w_xh = jnp.zeros((Ep + Hp, 4 * Hp), jnp.float32)
    b_g = jnp.zeros((1, 4 * Hp), jnp.float32)
    for k in range(4):
        w_xh = w_xh.at[:E, k * Hp:k * Hp + H].set(w_ih[k * H:(k + 1) * H, :].T)
        w_xh = w_xh.at[Ep:Ep + H, k * Hp:k * Hp + H].set(
            w_hh[k * H:(k + 1) * H, :].T)
        b_g = b_g.at[0, k * Hp:k * Hp + H].set(b[k * H:(k + 1) * H])

    w_fc_p = jnp.zeros((Hp, Vp), jnp.float32).at[:H, :V].set(w_fc.T)
    b_fc_p = jnp.zeros((1, Vp), jnp.float32).at[0, :V].set(b_fc)

    return {
        "embedding": raw["embedding"].astype(jnp.bfloat16),   # [V, E]
        "w_xh": w_xh.astype(jnp.bfloat16),                    # [Ep+Hp, 4Hp]
        "b_gate": b_g,                                        # [1, 4Hp] f32
        "w_fc": w_fc_p.astype(jnp.bfloat16),                  # [Hp, Vp]
        "b_fc": b_fc_p,                                       # [1, Vp]  f32
        "dims": (E, H, V, Ep, Hp, Vp, TN),
    }


# ----------------------------------------------------------------------------
# Forward wrapper
# ----------------------------------------------------------------------------
def decoder_forward(x_tokens, hidden, cell, packed):
    """
    x_tokens : [B] int32 token ids
    hidden   : [1, B, H] float32
    cell     : [1, B, H] float32
    returns (prediction [B, V], hidden [1, B, H], cell [1, B, H])
    """
    E, H, V, Ep, Hp, Vp, TN = packed["dims"]
    B = x_tokens.shape[0]
    Bp = _round_up(max(B, 8), 8)

    # Embedding lookup (x.unsqueeze(1) -> embed -> squeeze), as plain-JAX glue.
    emb = jnp.take(packed["embedding"], x_tokens, axis=0)        # [B, E] bf16
    h_prev = hidden[0]                                           # [B, H] f32
    c_prev = cell[0]                                             # [B, H] f32

    # Fused, padded [emb | h_prev] matmul input (bf16 for the MXU).
    xh = jnp.zeros((Bp, Ep + Hp), jnp.bfloat16)
    xh = xh.at[:B, :E].set(emb)
    xh = xh.at[:B, Ep:Ep + H].set(h_prev.astype(jnp.bfloat16))
    c_pad = jnp.zeros((Bp, Hp), jnp.float32).at[:B, :H].set(c_prev)

    w_xh, b_gate = packed["w_xh"], packed["b_gate"]
    w_fc, b_fc = packed["w_fc"], packed["b_fc"]

    grid = (Vp // TN,)

    flops = int(2 * Bp * (Ep + Hp) * 4 * Hp + 2 * Bp * Hp * Vp)
    transcendentals = int(5 * Bp * Hp)
    bytes_accessed = int(
        xh.size * 2 + c_pad.size * 4
        + w_xh.size * 2 + b_gate.size * 4
        + w_fc.size * 2 + b_fc.size * 4
        + Bp * Vp * 4 + 2 * Bp * Hp * 4
    )

    grid_spec = pltpu.PrefetchScalarGridSpec(
        num_scalar_prefetch=0,
        grid=grid,
        in_specs=[
            pl.BlockSpec((Bp, Ep + Hp), lambda j: (0, 0)),     # xh  (resident)
            pl.BlockSpec((Bp, Hp), lambda j: (0, 0)),          # c_prev
            pl.BlockSpec((Ep + Hp, 4 * Hp), lambda j: (0, 0)),  # W_xh (resident)
            pl.BlockSpec((1, 4 * Hp), lambda j: (0, 0)),       # b_gate
            pl.BlockSpec((Hp, TN), lambda j: (0, j)),          # W_fc tile stream
            pl.BlockSpec((1, TN), lambda j: (0, j)),           # b_fc tile stream
        ],
        out_specs=(
            pl.BlockSpec((Bp, TN), lambda j: (0, j)),          # pred tile
            pl.BlockSpec((Bp, Hp), lambda j: (0, 0)),          # h_new (resident)
            pl.BlockSpec((Bp, Hp), lambda j: (0, 0)),          # c_new (resident)
        ),
        scratch_shapes=[pltpu.VMEM((Bp, Hp), jnp.bfloat16)],   # h_new in bf16
    )

    pred_p, h_p, c_p = pl.pallas_call(
        _decoder_kernel,
        out_shape=(
            jax.ShapeDtypeStruct((Bp, Vp), jnp.float32),
            jax.ShapeDtypeStruct((Bp, Hp), jnp.float32),
            jax.ShapeDtypeStruct((Bp, Hp), jnp.float32),
        ),
        grid_spec=grid_spec,
        compiler_params=pltpu.CompilerParams(
            # Vocab tiles j>0 read the scratch written at j==0 -> sequential.
            # (For v7x 2-TC parallelism one would recompute the tiny LSTM per
            #  tile and mark this axis "parallel".)
            dimension_semantics=("arbitrary",),
            vmem_limit_bytes=48 * 1024 * 1024,   # safe on v7x (64 MiB) too
        ),
        cost_estimate=pl.CostEstimate(
            flops=flops,
            transcendentals=transcendentals,
            bytes_accessed=bytes_accessed,
        ),
    )(xh, c_pad, w_xh, b_gate, w_fc, b_fc)

    pred = pred_p[:B, :V]
    return pred, h_p[:B, :H][None, :, :], c_p[:B, :H][None, :, :]


# ----------------------------------------------------------------------------
# Synthetic parameters + pure-JAX reference (mirrors the kernel's bf16
# weight quantization so the check is tight).
# ----------------------------------------------------------------------------
def init_raw_params(key, output_dim, embed_dim, hidden_dim):
    ks = jax.random.split(key, 7)
    bound = 1.0 / jnp.sqrt(hidden_dim)

    emb = jax.random.normal(ks[0], (output_dim, embed_dim), jnp.float32)
    emb = emb.at[0].set(0.0)  # padding_idx=0 row is zero, as in nn.Embedding

    w_ih = jax.random.uniform(ks[1], (4 * hidden_dim, embed_dim),
                              jnp.float32, -bound, bound)
    w_hh = jax.random.uniform(ks[2], (4 * hidden_dim, hidden_dim),
                              jnp.float32, -bound, bound)
    b_ih = jax.random.uniform(ks[3], (4 * hidden_dim,), jnp.float32, -bound, bound)
    b_hh = jax.random.uniform(ks[4], (4 * hidden_dim,), jnp.float32, -bound, bound)
    w_fc = jax.random.uniform(ks[5], (output_dim, hidden_dim),
                              jnp.float32, -bound, bound)
    b_fc = jax.random.uniform(ks[6], (output_dim,), jnp.float32, -bound, bound)

    return {"embedding": emb, "w_ih": w_ih, "w_hh": w_hh,
            "b_ih": b_ih, "b_hh": b_hh, "w_fc": w_fc, "b_fc": b_fc}


def reference_forward(x_tokens, hidden, cell, raw):
    q = lambda a: a.astype(jnp.bfloat16).astype(jnp.float32)
    emb = q(jnp.take(raw["embedding"], x_tokens, axis=0))
    h_prev, c_prev = hidden[0], cell[0]
    H = h_prev.shape[-1]
    gates = (emb @ q(raw["w_ih"]).T + q(h_prev) @ q(raw["w_hh"]).T
             + (raw["b_ih"] + raw["b_hh"]))
    i_g = jax.nn.sigmoid(gates[:, 0 * H:1 * H])
    f_g = jax.nn.sigmoid(gates[:, 1 * H:2 * H])
    g_g = jnp.tanh(gates[:, 2 * H:3 * H])
    o_g = jax.nn.sigmoid(gates[:, 3 * H:4 * H])
    c_new = f_g * c_prev + i_g * g_g
    h_new = o_g * jnp.tanh(c_new)
    pred = q(h_new) @ q(raw["w_fc"]).T + raw["b_fc"]
    return pred, h_new[None], c_new[None]


# ----------------------------------------------------------------------------
if __name__ == "__main__":
    output_dim = 300   # vocab size (padded to 384 -> 3 vocab tiles of 128)
    embed_dim = 32
    hidden_dim = 64    # matches the module's hidden_dim
    batch = 4

    key = jax.random.PRNGKey(0)
    k_param, k_tok, k_h, k_c = jax.random.split(key, 4)

    raw = init_raw_params(k_param, output_dim, embed_dim, hidden_dim)
    packed = pack_params(raw, embed_dim, hidden_dim, output_dim)

    x_tokens = jax.random.randint(k_tok, (batch,), 0, output_dim, dtype=jnp.int32)
    hidden = jax.random.normal(k_h, (1, batch, hidden_dim), jnp.float32)
    cell = jax.random.normal(k_c, (1, batch, hidden_dim), jnp.float32)

    pred, h_new, c_new = jax.block_until_ready(
        decoder_forward(x_tokens, hidden, cell, packed)
    )

    # Correctness check against the bf16-consistent pure-JAX reference.
    pred_r, h_r, c_r = reference_forward(x_tokens, hidden, cell, raw)
    assert pred.shape == (batch, output_dim)
    assert h_new.shape == (1, batch, hidden_dim)
    assert c_new.shape == (1, batch, hidden_dim)
    assert jnp.allclose(pred, pred_r, atol=1e-3, rtol=1e-3)
    assert jnp.allclose(h_new, h_r, atol=1e-3, rtol=1e-3)
    assert jnp.allclose(c_new, c_r, atol=1e-3, rtol=1e-3)

    # TODO(synk): multi-timestep fusion (carrying h/c in VMEM across a time
    # grid axis) would change the single-step module interface, so it is left
    # to the caller; this kernel keeps the original one-step forward semantics.
    print("KERNEL_OK")
</pallas_src>

<mosaic_0001>
module attributes {stable_mosaic.version = 11 : i64} {
  func.func @_decoder_kernel(%arg0: i32, %arg1: memref<8x256xbf16, #tpu.memory_space<vmem>>, %arg2: memref<8x128xf32, #tpu.memory_space<vmem>>, %arg3: memref<256x512xbf16, #tpu.memory_space<vmem>>, %arg4: memref<1x512xf32, #tpu.memory_space<vmem>>, %arg5: memref<128x128xbf16, #tpu.memory_space<vmem>>, %arg6: memref<1x128xf32, #tpu.memory_space<vmem>>, %arg7: memref<8x128xf32, #tpu.memory_space<vmem>>, %arg8: memref<8x128xf32, #tpu.memory_space<vmem>>, %arg9: memref<8x128xf32, #tpu.memory_space<vmem>>, %arg10: memref<8x128xbf16, #tpu.memory_space<vmem>>) attributes {dimension_semantics = [#tpu.dimension_semantics<arbitrary>], iteration_bounds = array<i64: 3>, scalar_prefetch = 0 : i64, scratch_operands = 1 : i64, tpu.core_type = #tpu.core_type<tc>, window_params = [{pipeline_mode = #tpu.pipeline_mode<synchronous>, transform_indices = @transform_0, window_bounds = array<i64: 8, 256>}, {pipeline_mode = #tpu.pipeline_mode<synchronous>, transform_indices = @transform_1, window_bounds = array<i64: 8, 128>}, {pipeline_mode = #tpu.pipeline_mode<synchronous>, transform_indices = @transform_2, window_bounds = array<i64: 256, 512>}, {pipeline_mode = #tpu.pipeline_mode<synchronous>, transform_indices = @transform_3, window_bounds = array<i64: 1, 512>}, {transform_indices = @transform_4, window_bounds = array<i64: 128, 128>}, {transform_indices = @transform_5, window_bounds = array<i64: 1, 128>}, {transform_indices = @transform_6, window_bounds = array<i64: 8, 128>}, {pipeline_mode = #tpu.pipeline_mode<synchronous>, transform_indices = @transform_7, window_bounds = array<i64: 8, 128>}, {pipeline_mode = #tpu.pipeline_mode<synchronous>, transform_indices = @transform_8, window_bounds = array<i64: 8, 128>}]} {
    %c0_i32 = arith.constant 0 : i32
    %0 = arith.cmpi eq, %arg0, %c0_i32 : i32
    %1 = arith.extui %0 : i1 to i32
    %c0_i32_0 = arith.constant 0 : i32
    %2 = arith.cmpi ne, %1, %c0_i32_0 : i32
    scf.if %2 {
      %c0_8 = arith.constant 0 : index
      %c0_9 = arith.constant 0 : index
      %10 = vector.load %arg1[%c0_8, %c0_9] : memref<8x256xbf16, #tpu.memory_space<vmem>>, vector<8x256xbf16>
      %c0_10 = arith.constant 0 : index
      %c0_11 = arith.constant 0 : index
      %11 = vector.load %arg3[%c0_10, %c0_11] : memref<256x512xbf16, #tpu.memory_space<vmem>>, vector<256x512xbf16>
      %cst_12 = arith.constant dense<0.000000e+00> : vector<8x512xf32>
      %12 = tpu.matmul %10, %11, %cst_12 {dimension_numbers = #tpu.dot_dimension_numbers<[1], [0], [0], [1], [0, 0, 1, 1], [], []>} : vector<8x256xbf16>, vector<256x512xbf16>, vector<8x512xf32> -> vector<8x512xf32>
      %c0_13 = arith.constant 0 : index
      %c0_14 = arith.constant 0 : index
      %13 = vector.load %arg4[%c0_13, %c0_14] : memref<1x512xf32, #tpu.memory_space<vmem>>, vector<1x512xf32>
      %14 = vector.broadcast %13 : vector<1x512xf32> to vector<8x512xf32>
      %15 = arith.addf %12, %14 : vector<8x512xf32>
      %16 = vector.extract_strided_slice %15 {offsets = [0, 0], sizes = [8, 128], strides = [1, 1]} : vector<8x512xf32> to vector<8x128xf32>
      %17 = arith.negf %16 : vector<8x128xf32>
      %18 = math.exp %17 : vector<8x128xf32>
      %cst_15 = arith.constant 1.000000e+00 : f32
      %19 = vector.broadcast %cst_15 : f32 to vector<8x128xf32>
      %20 = arith.addf %19, %18 : vector<8x128xf32>
      %21 = arith.divf %19, %20 : vector<8x128xf32>
      %22 = vector.extract_strided_slice %15 {offsets = [0, 128], sizes = [8, 128], strides = [1, 1]} : vector<8x512xf32> to vector<8x128xf32>
      %23 = arith.negf %22 : vector<8x128xf32>
      %24 = math.exp %23 : vector<8x128xf32>
      %cst_16 = arith.constant 1.000000e+00 : f32
      %25 = vector.broadcast %cst_16 : f32 to vector<8x128xf32>
      %26 = arith.addf %25, %24 : vector<8x128xf32>
      %27 = arith.divf %25, %26 : vector<8x128xf32>
      %28 = vector.extract_strided_slice %15 {offsets = [0, 256], sizes = [8, 128], strides = [1, 1]} : vector<8x512xf32> to vector<8x128xf32>
      %29 = math.tanh %28 : vector<8x128xf32>
      %30 = vector.extract_strided_slice %15 {offsets = [0, 384], sizes = [8, 128], strides = [1, 1]} : vector<8x512xf32> to vector<8x128xf32>
      %31 = arith.negf %30 : vector<8x128xf32>
      %32 = math.exp %31 : vector<8x128xf32>
      %cst_17 = arith.constant 1.000000e+00 : f32
      %33 = vector.broadcast %cst_17 : f32 to vector<8x128xf32>
      %34 = arith.addf %33, %32 : vector<8x128xf32>
      %35 = arith.divf %33, %34 : vector<8x128xf32>
      %c0_18 = arith.constant 0 : index
      %c0_19 = arith.constant 0 : index
      %36 = vector.load %arg2[%c0_18, %c0_19] : memref<8x128xf32, #tpu.memory_space<vmem>>, vector<8x128xf32>
      %37 = arith.mulf %27, %36 : vector<8x128xf32>
      %38 = arith.mulf %21, %29 : vector<8x128xf32>
      %39 = arith.addf %37, %38 : vector<8x128xf32>
      %40 = math.tanh %39 : vector<8x128xf32>
      %41 = arith.mulf %35, %40 : vector<8x128xf32>
      %c0_20 = arith.constant 0 : index
      %c0_21 = arith.constant 0 : index
      %42 = vector.load %arg9[%c0_20, %c0_21] : memref<8x128xf32, #tpu.memory_space<vmem>>, vector<8x128xf32>
      tpu.vector_store %arg9[%c0_20, %c0_21], %39 {strides = array<i32>} : memref<8x128xf32, #tpu.memory_space<vmem>>, vector<8x128xf32>,
      %c0_22 = arith.constant 0 : index
      %c0_23 = arith.constant 0 : index
      %43 = vector.load %arg8[%c0_22, %c0_23] : memref<8x128xf32, #tpu.memory_space<vmem>>, vector<8x128xf32>
      tpu.vector_store %arg8[%c0_22, %c0_23], %41 {strides = array<i32>} : memref<8x128xf32, #tpu.memory_space<vmem>>, vector<8x128xf32>,
      %44 = arith.truncf %41 : vector<8x128xf32> to vector<8x128xbf16>
      %c0_24 = arith.constant 0 : index
      %c0_25 = arith.constant 0 : index
      %45 = vector.load %arg10[%c0_24, %c0_25] : memref<8x128xbf16, #tpu.memory_space<vmem>>, vector<8x128xbf16>
      tpu.vector_store %arg10[%c0_24, %c0_25], %44 {strides = array<i32>} : memref<8x128xbf16, #tpu.memory_space<vmem>>, vector<8x128xbf16>,
    } else {
    }
    %c0 = arith.constant 0 : index
    %c0_1 = arith.constant 0 : index
    %3 = vector.load %arg10[%c0, %c0_1] : memref<8x128xbf16, #tpu.memory_space<vmem>>, vector<8x128xbf16>
    %c0_2 = arith.constant 0 : index
    %c0_3 = arith.constant 0 : index
    %4 = vector.load %arg5[%c0_2, %c0_3] : memref<128x128xbf16, #tpu.memory_space<vmem>>, vector<128x128xbf16>
    %cst = arith.constant dense<0.000000e+00> : vector<8x128xf32>
    %5 = tpu.matmul %3, %4, %cst {dimension_numbers = #tpu.dot_dimension_numbers<[1], [0], [0], [1], [0, 0, 1, 1], [], []>} : vector<8x128xbf16>, vector<128x128xbf16>, vector<8x128xf32> -> vector<8x128xf32>
    %c0_4 = arith.constant 0 : index
    %c0_5 = arith.constant 0 : index
    %6 = vector.load %arg6[%c0_4, %c0_5] : memref<1x128xf32, #tpu.memory_space<vmem>>, vector<1x128xf32>
    %7 = vector.broadcast %6 : vector<1x128xf32> to vector<8x128xf32>
    %8 = arith.addf %5, %7 : vector<8x128xf32>
    %c0_6 = arith.constant 0 : index
    %c0_7 = arith.constant 0 : index
    %9 = vector.load %arg7[%c0_6, %c0_7] : memref<8x128xf32, #tpu.memory_space<vmem>>, vector<8x128xf32>
    tpu.vector_store %arg7[%c0_6, %c0_7], %8 {strides = array<i32>} : memref<8x128xf32, #tpu.memory_space<vmem>>, vector<8x128xf32>,
    return
  }
  func.func @transform_0(%arg0: i32) -> (i32, i32) {
    %c0_i32 = arith.constant 0 : i32
    %c0_i32_0 = arith.constant 0 : i32
    %c0_i32_1 = arith.constant 0 : i32
    return %c0_i32, %c0_i32_0 : i32, i32
  }
  func.func @transform_1(%arg0: i32) -> (i32, i32) {
    %c0_i32 = arith.constant 0 : i32
    %c0_i32_0 = arith.constant 0 : i32
    %c0_i32_1 = arith.constant 0 : i32
    return %c0_i32, %c0_i32_0 : i32, i32
  }
  func.func @transform_2(%arg0: i32) -> (i32, i32) {
    %c0_i32 = arith.constant 0 : i32
    %c0_i32_0 = arith.constant 0 : i32
    %c0_i32_1 = arith.constant 0 : i32
    return %c0_i32, %c0_i32_0 : i32, i32
  }
  func.func @transform_3(%arg0: i32) -> (i32, i32) {
    %c0_i32 = arith.constant 0 : i32
    %c0_i32_0 = arith.constant 0 : i32
    %c0_i32_1 = arith.constant 0 : i32
    return %c0_i32, %c0_i32_0 : i32, i32
  }
  func.func @transform_4(%arg0: i32) -> (i32, i32) {
    %c0_i32 = arith.constant 0 : i32
    %c0_i32_0 = arith.constant 0 : i32
    return %c0_i32, %arg0 : i32, i32
  }
  func.func @transform_5(%arg0: i32) -> (i32, i32) {
    %c0_i32 = arith.constant 0 : i32
    %c0_i32_0 = arith.constant 0 : i32
    return %c0_i32, %arg0 : i32, i32
  }
  func.func @transform_6(%arg0: i32) -> (i32, i32) {
    %c0_i32 = arith.constant 0 : i32
    %c0_i32_0 = arith.constant 0 : i32
    return %c0_i32, %arg0 : i32, i32
  }
  func.func @transform_7(%arg0: i32) -> (i32, i32) {
    %c0_i32 = arith.constant 0 : i32
    %c0_i32_0 = arith.constant 0 : i32
    %c0_i32_1 = arith.constant 0 : i32
    return %c0_i32, %c0_i32_0 : i32, i32
  }
  func.func @transform_8(%arg0: i32) -> (i32, i32) {
    %c0_i32 = arith.constant 0 : i32
    %c0_i32_0 = arith.constant 0 : i32
    %c0_i32_1 = arith.constant 0 : i32
    return %c0_i32, %c0_i32_0 : i32, i32
  }
}

</mosaic_0001>

<bundles_post_ra>
// kernel: tpu_custom_call.1
= control target key start
LH: loop header
LB: loop body
LE: loop exit
PB: predicated region body
PF: predicated region fallthrough
CT: control target
= control target key end

     0   :  { %s2163_s0 = inlined_call_operand.hbm [shape: bf16[8,256], index: 0, kind: input, shape index: {}]   ;;  %s2164_s1 = inlined_call_operand.hbm [shape: f32[8,128], index: 1, kind: input, shape index: {}]   ;;  %s2165_s2 = inlined_call_operand.hbm [shape: bf16[256,512], index: 2, kind: input, shape index: {}]   ;;  %s2166_s3 = inlined_call_operand.vmem [shape: f32[1,512], index: 3, kind: input, shape index: {}]   ;;  %s2167_s4 = inlined_call_operand.hbm [shape: bf16[128,384], index: 4, kind: input, shape index: {}]   ;;  %s2168_s5 = inlined_call_operand.vmem [shape: f32[1,384], index: 5, kind: input, shape index: {}]   ;;  %s2169_s6 = inlined_call_operand.hbm [shape: f32[8,384], index: 6, kind: output, shape index: {0}]   ;;  %s2170_s7 = inlined_call_operand.hbm [shape: f32[8,128], index: 7, kind: output, shape index: {1}]   ;;  %s2171_s8 = inlined_call_operand.hbm [shape: f32[8,128], index: 8, kind: output, shape index: {2}]  }
   0x1   :  { %2181 = sst [smem:[#allocation23_spill]] %s2164_s1 }
   0x2   :  { %14 = vsyncpa [#allocation4], 0 }
   0x3   :  { %15 = vsyncpa [#allocation7], 0 }
   0x4   :  { %16 = vsyncpa [#allocation10], 0 }
   0x5   :  { %18 = vsyncpa [#allocation10 + $0x1], 0 }
   0x6   :  { %19 = vsyncpa [#allocation5], 0 }
   0x7   :  { %21 = vsyncpa [#allocation5 + $0x1], 0 }
   0x8   :  { %22 = vsyncpa [#allocation13], 0  ;;  %s1838_s27 = smov 0   ;;  %s1840_s28 = smov 0  }
   0x9   :  { %s1842_s29 = smov 0   ;;  %s1844_s30 = smov 0  }
   0xa LB: > { %s1859_s9 = sadd.s32 4294967295, %s1777_s30   ;;  %s1183_s10 = sadd.s32 4294967294, %s1777_s30   ;;  %s1777_s30 = sphi %s1844_s30, %s2214_s30   ;;  %s1773_s29 = sphi %s1842_s29, %s2218_s29   ;;  %s1769_s28 = sphi %s1840_s28, %s2217_s28   ;;  %s1765_s27 = sphi %s1838_s27, %s2216_s27  }
   0xb   : > { %s1863_s11 = sadd.s32 1, %s1777_s30   ;;  %s119_s12 = sadd.s32 1, %s1773_s29 }
   0xc   : > { %2182 = sst [smem:[#allocation20_spill]] %s1863_s11  ;;  %s116_s13 = ssub.s32 %s1777_s30, %s1863_s11 }
   0xd   : > { %p126_p0 = scmp.ne.s32.totalorder %s1773_s29, %s1769_s28  ;;  %p117_p1 = scmp.eq.s32.totalorder %s116_s13, 0 }
   0xe   : > { %p127_p2 = scmp.eq.s32.totalorder %s1777_s30, 0  ;;  %p132_p3 = scmp.ne.s32.totalorder %s1769_s28, %s1765_s27 }
   0xf   : > { %p2172_p4 = scmp.eq.s32.totalorder %s1859_s9, 0  ;;  %p2173_p7 = scmp.eq.s32.totalorder %s1859_s9, 2 }
  0x10   : > { %s1875_s14 = scalar_select %p117_p1, %s1773_s29, %s119_s12  }
  0x11   : > { %p1877_p5 = por %p127_p2, %p126_p0  ;;  %p1883_p6 = por %p2172_p4, %p132_p3 }
  0x12   : > { %2183 = sst [smem:[#allocation21_spill]] %s1875_s14  ;;  %p188_p8 = scmp.eq.s32.totalorder %s1183_s10, 2 }
  0x13   : > { %s2185_s16 = scalar_select %p1883_p6, 1, 0 }
  0x14   : > { %p1184_p9 = scmp.ge.s32.totalorder %s1777_s30, 1  ;;  %p237_p10 = scmp.lt.s32.totalorder %s1777_s30, 4 }
  0x15   : > { %p1892_p11 = por %p2173_p7, %p126_p0  ;;  %p1896_p12 = por %p188_p8, %p132_p3 }
  0x16   : > { %p1900_p13 = pnand %p1184_p9, %p237_p10  ;;  %s1779_s20 = smov [#allocation6]  }
  0x17   : > { %s2186_s17 = scalar_select %p1892_p11, 1, 0 }
  0x18   : > { %s2187_s18 = scalar_select %p1896_p12, 1, 0 }
  0x19   : > { %s2189_s19 = scalar_select %p1900_p13, 1, 0 }
  0x1a   : > { %2188 = sst [smem:[#allocation22_spill]] %s2187_s18  ;;  %p1337_p2 = pneg %p1900_p13 }
  0x1b   : > { %s261_s21 = sshll.u32 %s1779_s20, 4  ;;  %p1358_p4 = scmp.lt.s32.totalorder %s1777_s30, 3  ;;  %s262_s21 = int_to_ptr.vmem [resolvable:$true] %s261_s21 }
  0x1c   : > { %p2190_p0 = scmp.eq.s32.totalorder %s1859_s9, 0  ;;  %s1780_s24 = smov [#allocation3]  }
  0x1d   : > { %p1916_p3 = pnand %p1358_p4, %p1877_p5  ;;  %s250_s25 = sshll.u32 %s1780_s24, 4  ;;  %s1920_s25 = int_to_ptr.vmem [resolvable:$true] %s250_s25 }
  0x1e   : > { %p1910_p7 = pnand %p1337_p2, %p2190_p0  ;;  %s2193_s1 = sld [smem:[#allocation23_spill]] }
  0x1f   : > { %s2192_s23 = scalar_select %p1916_p3, 1, 0 }
  0x20   : > { %p1930_p9 = pneg %p1910_p7 }
  0x24   : > { %s1533_s12 = scalar_lea.hbm %s2193_s1, 128 }
  0x25   : > { %p1534_p8 = scmp.ne.s32.totalorder %s2193_s1, %s1533_s12  ;;  %p1540_p10 = scmp.lt.u32.totalorder %s1533_s12, %s2193_s1 }
  0x27   : > { %p1536_p4 = pnand %p1930_p9, %p1534_p8 }
  0x29   : > { %p1537_p5 = pneg %p1536_p4 }
  0x2b   : > { %p1542_p2 = pnand %p1540_p10, %p1537_p5 }
  0x2d   : > { %1545 = shalt.err (!%p1542_p2)
}
  0x2e   : > { %s1546_s26 = scalar_lea.vmem %s262_s21, 128  ;;  %p1554_p11 = scmp.lt.s32.totalorder %s262_s21, %s262_s21 }
  0x2f   : > { %p1547_p0 = scmp.ne.s32.totalorder %s262_s21, %s1546_s26  ;;  %p1555_p6 = scmp.lt.s32.totalorder %s1546_s26, %s1546_s26 }
  0x31   : > { %p1549_p1 = pnand %p1547_p0, %p1930_p9  ;;  %p1556_p13 = por %p1555_p6, %p1554_p11 }
  0x33   : > { %p1550_p12 = pneg %p1549_p1 }
  0x35   : > { %p1557_p3 = pnand %p1556_p13, %p1550_p12 }
  0x37   : > { %1560 = shalt.err (!%p1557_p3)
}
  0x38   : > { %1343 = dma.hbm_to_vmem [thread:$0]  (!%p1910_p7), %s2193_s1, 128, %s262_s21, [#allocation7]  }
  0x39   : > { %s1561_s20 = scalar_lea.hbm %s2163_s0, 128 }
  0x3a   : > { %p1562_p1 = scmp.ne.s32.totalorder %s2163_s0, %s1561_s20  ;;  %p1568_p11 = scmp.lt.u32.totalorder %s1561_s20, %s2163_s0 }
  0x3c   : > { %p1564_p8 = pnand %p1562_p1, %p1930_p9 }
  0x3e   : > { %p1565_p6 = pneg %p1564_p8 }
  0x40   : > { %p1570_p12 = pnand %p1568_p11, %p1565_p6 }
  0x42   : > { %1573 = shalt.err (!%p1570_p12)
}
  0x43   : > { %s1574_s21 = scalar_lea.vmem %s1920_s25, 128  ;;  %p1582_p5 = scmp.lt.s32.totalorder %s1920_s25, %s1920_s25 }
  0x44   : > { %p1575_p13 = scmp.ne.s32.totalorder %s1920_s25, %s1574_s21  ;;  %p1583_p10 = scmp.lt.s32.totalorder %s1574_s21, %s1574_s21 }
  0x46   : > { %p1577_p3 = pnand %p1575_p13, %p1930_p9  ;;  %p1584_p2 = por %p1583_p10, %p1582_p5 }
  0x48   : > { %p1578_p4 = pneg %p1577_p3 }
  0x4a   : > { %p1585_p0 = pnand %p1584_p2, %p1578_p4 }
  0x4c   : > { %1588 = shalt.err (!%p1585_p0)
}
  0x4d   : > { %1340 = dma.hbm_to_vmem [thread:$0]  (!%p1910_p7), %s2163_s0, 128, %s1920_s25, [#allocation4]  }
  0x4e   : > { %s1781_s10 = smov [#allocation8]   ;;  %s1589_s20 = scalar_lea.hbm %s2165_s2, 8192 }
  0x4f   : > { %s271_s13 = sshll.u32 %s1781_s10, 4  ;;  %p1590_p1 = scmp.ne.s32.totalorder %s2165_s2, %s1589_s20  ;;  %s272_s13 = int_to_ptr.vmem [resolvable:$true] %s271_s13 }
  0x50   : > { %p1596_p11 = scmp.lt.u32.totalorder %s1589_s20, %s2165_s2 }
  0x51   : > { %p1592_p8 = pnand %p1590_p1, %p1930_p9 }
  0x53   : > { %p1593_p6 = pneg %p1592_p8 }
  0x55   : > { %p1598_p12 = pnand %p1596_p11, %p1593_p6 }
  0x57   : > { %1601 = shalt.err (!%p1598_p12)
}
  0x58   : > { %s1602_s25 = scalar_lea.vmem %s272_s13, 8192  ;;  %p1610_p5 = scmp.lt.s32.totalorder %s272_s13, %s272_s13 }
  0x59   : > { %p1603_p13 = scmp.ne.s32.totalorder %s272_s13, %s1602_s25  ;;  %p1611_p10 = scmp.lt.s32.totalorder %s1602_s25, %s1602_s25 }
  0x5b   : > { %p1605_p3 = pnand %p1603_p13, %p1930_p9  ;;  %p1612_p2 = por %p1611_p10, %p1610_p5 }
  0x5d   : > { %p1606_p4 = pneg %p1605_p3 }
  0x5f   : > { %p1613_p0 = pnand %p1612_p2, %p1606_p4 }
  0x61   : > { %1616 = shalt.err (!%p1613_p0)
}
  0x62   : > { %s1782_s11 = smov 256   ;;  %s1783_s1 = smov 16  }
  0x63   : > { %1346 = dma.hbm_to_vmem [thread:$0]  (!%p1910_p7), %s2165_s2, 8192, %s272_s13, [#allocation7], %s1782_s11, %s1782_s11, %s1783_s1  }
  0x64   : > { %s288_s15 = sand.u32 1, %s1773_s29   ;;  %s1190_s14 = sshll.u32 %s1777_s30, 6 }
  0x65   : > { %s1189_s12 = sshll.u32 %s288_s15, 6  ;;  %s1992_s26 = scalar_lea.hbm %s2167_s4, %s1190_s14 }
  0x66   : > { %s292_s21 = scalar_lea.vmem [#allocation9], %s1189_s12  ;;  %s1996_s22 = scalar_lea.sflag [#allocation10], %s288_s15 }
  0x67   : > { %s298_s25 = sshll.u32 %s292_s21, 4  ;;  %s1617_s18 = scalar_lea.hbm %s1992_s26, 1024  ;;  %s1994_s25 = int_to_ptr.vmem [resolvable:$true] %s298_s25 }
  0x68   : > { %p1618_p7 = scmp.ne.s32.totalorder %s1992_s26, %s1617_s18  ;;  %p2195_p9 = scmp.ne.s32.totalorder %s2192_s23, 0 }
  0x69   : > { %s1622_s1 = scalar_lea.hbm %s2167_s4, 3072  ;;  %p1623_p11 = scmp.lt.u32.totalorder %s1992_s26, %s2167_s4 }
  0x6a   : > { %p1619_p1 = pneg %p2195_p9  ;;  %p1624_p12 = scmp.lt.u32.totalorder %s1622_s1, %s1617_s18 }
  0x6b   : > { %p1626_p3 = scmp.lt.u32.totalorder %s1617_s18, %s1992_s26 }
  0x6c   : > { %p1620_p8 = pnand %p1619_p1, %p1618_p7  ;;  %p1625_p13 = por %p1624_p12, %p1623_p11 }
  0x6e   : > { %p1621_p6 = pneg %p1620_p8  ;;  %p1627_p4 = por %p1626_p3, %p1625_p13 }
  0x70   : > { %p1628_p5 = pnand %p1627_p4, %p1621_p6 }
  0x72   : > { %1631 = shalt.err (!%p1628_p5)
}
  0x73   : > { %s1632_s15 = scalar_lea.vmem %s1994_s25, 1024  ;;  %s1784_s12 = smov [#allocation9]  }
  0x74   : > { %p1633_p10 = scmp.ne.s32.totalorder %s1994_s25, %s1632_s15  ;;  %s1637_s20 = sshll.u32 %s1784_s12, 4  ;;  %s1638_s20 = int_to_ptr.vmem [resolvable:$false] %s1637_s20 }
  0x75   : > { %s1639_s24 = scalar_lea.vmem %s1638_s20, 2048  ;;  %p1640_p7 = scmp.lt.s32.totalorder %s1994_s25, %s1638_s20 }
  0x76   : > { %p1635_p2 = pnand %p1633_p10, %p1619_p1  ;;  %p1641_p8 = scmp.lt.s32.totalorder %s1639_s24, %s1632_s15 }
  0x78   : > { %p1636_p0 = pneg %p1635_p2  ;;  %p1642_p11 = por %p1641_p8, %p1640_p7 }
  0x7a   : > { %p1643_p12 = pnand %p1642_p11, %p1636_p0 }
  0x7c   : > { %1646 = shalt.err (!%p1643_p12)
}
  0x7d   : > { %s1785_s21 = smov 192   ;;  %s1786_s18 = smov 64  }
  0x7e   : > { %s1787_s13 = smov 4   ;;  %p2196_p1 = scmp.ne.s32.totalorder %s2189_s19, 0 }
  0x7f   : > { %1350 = dma.hbm_to_vmem [thread:$0]  (!%p2195_p9), %s1992_s26, 1024, %s1994_s25, %s1996_s22, %s1785_s21, %s1786_s18, %s1787_s13  }
  0x80   : > { %316 = sbr.rel (%p2196_p1) target bundleno = 738 (0x2e2), region = 44  ;;  %p2197_p6 = scmp.eq.s32.totalorder (!%p2196_p1), %s1859_s9, 0 }
  0x87   : > { %1744 = dma.done.wait (%p2197_p6), [#allocation4], 128   ;;  %p2198_p13 = pmov %p2197_p6 }
  0x88   : > { %p2199_p3 = pmov %p2197_p6 }
  0x89   : > { %1746 = vsyncadd (%p2198_p13), [#allocation4], 4294967168 }
  0x8a   : > { %1748 = dma.done.wait (%p2199_p3), [#allocation7], 8320   ;;  %p2200_p4 = pmov %p2199_p3 }
  0x8b   : > { %s2035_s11 = sand.u32 1, %s1769_s28   ;;  %p2201_p9 = scmp.ne.s32.totalorder %s2185_s16, 0 }
  0x8c   : > { %1750 = vsyncadd (%p2200_p4), [#allocation7], 4294958976  ;;  %s1195_s19 = sshll.u32 %s2035_s11, 6  ;;  %s331_s23 = scalar_lea.sflag [#allocation10], %s2035_s11 }
  0x8d   : > { %s2039_s26 = scalar_lea.vmem [#allocation9], %s1195_s19 }
  0x8e   : > { %1752 = dma.done.wait (%p2201_p9), %s331_s23, 1024  }
  0x8f   : > { %1754 = vsyncadd (%p2201_p9), %s331_s23, 4294966272  ;;  %s1196_s25 = sshll.u32 %s2035_s11, 3  ;;  %p370_p5 = scmp.lt.s32.totalorder %s1859_s9, 2 }
  0x90   : > { %s2054_s15 = scalar_lea.vmem [#allocation11], %s1196_s25  ;;  %p2202_p10 = scmp.ne.s32.totalorder %s1859_s9, 0 }
  0x91   : > { %s2048_s22 = scalar_select %p370_p5, %s1859_s9, 2 }
  0x92   : > { %377 = sbr.rel (%p2202_p10) target bundleno = 472 (0x1d8), region = 64  ;;  %v1411_v0 = vld [vmem:[#allocation8 + $0x4] ss:$16 sps:$4 sm:$0xff] (!%p2202_p10)   ;;  %v1413_v1 = vld [vmem:[#allocation8] ss:$16 sps:$4 sm:$0xff] (!%p2202_p10)  }
  0x93   : > { %s372_s14 = scalar_lea.vmem %s2168_s5, %s2048_s22  ;;  %792 = vmatprep.subr.bf16.mxu0 (!%p2202_p10), %v1411_v0  ;;  %v1414_v2 = vld [vmem:[#allocation8 + $0x24] ss:$16 sps:$4 sm:$0xff] (!%p2202_p10)   ;;  %v1416_v3 = vld [vmem:[#allocation8 + $0x20] ss:$16 sps:$4 sm:$0xff] (!%p2202_p10)   ;;  %v1422_v5 = vld [vmem:[#allocation8 + $0xc] ss:$16 sps:$4 sm:$0xff] (!%p2202_p10)  }
  0x94   : > { %793 = vmatpush1.bf16.msra.mxu0 (!%p2202_p10), %v1413_v1  ;;  %v1417_v4 = vld [vmem:[#allocation8 + $0x44] ss:$16 sps:$4 sm:$0xff] (!%p2202_p10)   ;;  %v1425_v6 = vld [vmem:[#allocation8 + $0x8] ss:$16 sps:$4 sm:$0xff] (!%p2202_p10)   ;;  %v1419_v7 = vld [vmem:[#allocation8 + $0x40] ss:$16 sps:$4 sm:$0xff] (!%p2202_p10)   ;;  %833 = vmatprep.subr.bf16.mxu1 (!%p2202_p10), %v1422_v5 }
  0x95   : > { %794 = vmatprep.subr.bf16.mxu0 (!%p2202_p10), %v1414_v2  ;;  %v1420_v8 = vld [vmem:[#allocation8 + $0x64] ss:$16 sps:$4 sm:$0xff] (!%p2202_p10)   ;;  %834 = vmatpush1.bf16.msra.mxu1 (!%p2202_p10), %v1425_v6  ;;  %v1428_v9 = vld [vmem:[#allocation8 + $0x2c] ss:$16 sps:$4 sm:$0xff] (!%p2202_p10)   ;;  %v1431_v10 = vld [vmem:[#allocation8 + $0x28] ss:$16 sps:$4 sm:$0xff] (!%p2202_p10)  }
  0x96   : > { %835 = vmatprep.subr.bf16.mxu1 (!%p2202_p10), %v1428_v9  ;;  %v1424_v11 = vld [vmem:[#allocation8 + $0x60] ss:$16 sps:$4 sm:$0xff] (!%p2202_p10)   ;;  %v1426_v12 = vld [vmem:[#allocation8 + $0x84] ss:$16 sps:$4 sm:$0xff] (!%p2202_p10)   ;;  %v1434_v13 = vld [vmem:[#allocation8 + $0x4c] ss:$16 sps:$4 sm:$0xff] (!%p2202_p10)  }
  0x97   : > { %v1437_v14 = vld [vmem:[#allocation8 + $0x48] ss:$16 sps:$4 sm:$0xff] (!%p2202_p10)   ;;  %v1440_v15 = vld [vmem:[#allocation8 + $0x6c] ss:$16 sps:$4 sm:$0xff] (!%p2202_p10)   ;;  %v1430_v16 = vld [vmem:[#allocation8 + $0x80] ss:$16 sps:$4 sm:$0xff] (!%p2202_p10)  }
  0x98   : > { %795 = vmatpush1.bf16.msra.mxu0 (!%p2202_p10), %v1416_v3  ;;  %v1432_v17 = vld [vmem:[#allocation8 + $0xa4] ss:$16 sps:$4 sm:$0xff] (!%p2202_p10)   ;;  %v1443_v18 = vld [vmem:[#allocation8 + $0x68] ss:$16 sps:$4 sm:$0xff] (!%p2202_p10)   ;;  %v1446_v19 = vld [vmem:[#allocation8 + $0x8c] ss:$16 sps:$4 sm:$0xff] (!%p2202_p10)   ;;  %v445_v3 = vlaneseq (!%p2202_p10) }
  0x99   : > { %796 = vmatprep.subr.bf16.mxu0 %v1417_v4  ;;  %836 = vmatpush1.bf16.msra.mxu1 %v1431_v10  ;;  %v1436_v20 = vld [vmem:[#allocation8 + $0xa0] ss:$16 sps:$4 sm:$0xff]   ;;  %v1438_v21 = vld [vmem:[#allocation8 + $0xc4] ss:$16 sps:$4 sm:$0xff]   ;;  %v1449_v22 = vld [vmem:[#allocation8 + $0x88] ss:$16 sps:$4 sm:$0xff]  }
  0x9a   : > { %837 = vmatprep.subr.bf16.mxu1 %v1434_v13  ;;  %v1452_v23 = vld [vmem:[#allocation8 + $0xac] ss:$16 sps:$4 sm:$0xff]   ;;  %v1442_v24 = vld [vmem:[#allocation8 + $0xc0] ss:$16 sps:$4 sm:$0xff]   ;;  %v1444_v25 = vld [vmem:[#allocation8 + $0xe4] ss:$16 sps:$4 sm:$0xff]  }
  0x9b   : > { %v1455_v26 = vld [vmem:[#allocation8 + $0xa8] ss:$16 sps:$4 sm:$0xff]   ;;  %v1458_v27 = vld [vmem:[#allocation8 + $0xcc] ss:$16 sps:$4 sm:$0xff]   ;;  %v1448_v28 = vld [vmem:[#allocation8 + $0xe0] ss:$16 sps:$4 sm:$0xff]  }
  0x9c   : > { %797 = vmatpush1.bf16.msra.mxu0 %v1419_v7  ;;  %v1450_v29 = vld [vmem:[#allocation8 + $0x104] ss:$16 sps:$4 sm:$0xff]   ;;  %v1461_v30 = vld [vmem:[#allocation8 + $0xc8] ss:$16 sps:$4 sm:$0xff]   ;;  %v1464_v31 = vld [vmem:[#allocation8 + $0xec] ss:$16 sps:$4 sm:$0xff]  }
  0x9d   : > { %798 = vmatprep.subr.bf16.mxu0 %v1420_v8  ;;  %838 = vmatpush1.bf16.msra.mxu1 %v1437_v14  ;;  %v1454_v32 = vld [vmem:[#allocation8 + $0x100] ss:$16 sps:$4 sm:$0xff]   ;;  %v1456_v33 = vld [vmem:[#allocation8 + $0x124] ss:$16 sps:$4 sm:$0xff]   ;;  %v1467_v34 = vld [vmem:[#allocation8 + $0xe8] ss:$16 sps:$4 sm:$0xff]  }
  0x9e   : > { %839 = vmatprep.subr.bf16.mxu1 %v1440_v15  ;;  %v1470_v35 = vld [vmem:[#allocation8 + $0x10c] ss:$16 sps:$4 sm:$0xff]   ;;  %v1460_v36 = vld [vmem:[#allocation8 + $0x120] ss:$16 sps:$4 sm:$0xff]   ;;  %v1462_v37 = vld [vmem:[#allocation8 + $0x144] ss:$16 sps:$4 sm:$0xff]  }
  0x9f   : > { %v1473_v38 = vld [vmem:[#allocation8 + $0x108] ss:$16 sps:$4 sm:$0xff]   ;;  %v1476_v39 = vld [vmem:[#allocation8 + $0x12c] ss:$16 sps:$4 sm:$0xff]   ;;  %v1466_v40 = vld [vmem:[#allocation8 + $0x140] ss:$16 sps:$4 sm:$0xff]  }
  0xa0   : > { %799 = vmatpush1.bf16.msra.mxu0 %v1424_v11  ;;  %v378_v41 = vld [vmem:[#allocation3] sm:$0xff]  ;;  %v1479_v44 = vld [vmem:[#allocation8 + $0x128] ss:$16 sps:$4 sm:$0xff]   ;;  %v1482_v45 = vld [vmem:[#allocation8 + $0x14c] ss:$16 sps:$4 sm:$0xff]   ;;  %v446_v4 = vshrl.u32 %v445_v3, 7 }
  0xa1   : > { %800 = vmatprep.subr.bf16.mxu0 %v1426_v12  ;;  %840 = vmatpush1.bf16.msra.mxu1 %v1443_v18  ;;  %v1468_v42 = vld [vmem:[#allocation8 + $0x164] ss:$16 sps:$4 sm:$0xff]   ;;  %v1199_v43 = vcombine.high %v378_v41, %v378_v41  ;;  %v1472_v46 = vld [vmem:[#allocation8 + $0x160] ss:$16 sps:$4 sm:$0xff]   ;;  %v1485_v48 = vld [vmem:[#allocation8 + $0x148] ss:$16 sps:$4 sm:$0xff]   ;;  %v1198_v1 = vcombine.low %v378_v41, %v378_v41 }
  0xa2   : > { %841 = vmatprep.subr.bf16.mxu1 %v1446_v19  ;;  %v1474_v47 = vld [vmem:[#allocation8 + $0x184] ss:$16 sps:$4 sm:$0xff]   ;;  %v1488_v49 = vld [vmem:[#allocation8 + $0x16c] ss:$16 sps:$4 sm:$0xff]   ;;  %v1478_v50 = vld [vmem:[#allocation8 + $0x180] ss:$16 sps:$4 sm:$0xff]  }
  0xa3   : > { %824 = vmatprep.mubr.bf16.mxu0 %v1199_v43  ;;  %865 = vmatprep.mubr.bf16.mxu1 %v1199_v43  ;;  %v1480_v51 = vld [vmem:[#allocation8 + $0x1a4] ss:$16 sps:$4 sm:$0xff]   ;;  %v1491_v52 = vld [vmem:[#allocation8 + $0x168] ss:$16 sps:$4 sm:$0xff]   ;;  %v1494_v53 = vld [vmem:[#allocation8 + $0x18c] ss:$16 sps:$4 sm:$0xff]  }
  0xa4   : > { %801 = vmatpush1.bf16.msra.mxu0 %v1430_v16  ;;  %v1484_v54 = vld [vmem:[#allocation8 + $0x1a0] ss:$16 sps:$4 sm:$0xff]   ;;  %v1486_v55 = vld [vmem:[#allocation8 + $0x1c4] ss:$16 sps:$4 sm:$0xff]   ;;  %v1497_v56 = vld [vmem:[#allocation8 + $0x188] ss:$16 sps:$4 sm:$0xff]  }
  0xa5   : > { %802 = vmatprep.subr.bf16.mxu0 %v1432_v17  ;;  %842 = vmatpush1.bf16.msra.mxu1 %v1449_v22  ;;  %v1500_v57 = vld [vmem:[#allocation8 + $0x1ac] ss:$16 sps:$4 sm:$0xff]   ;;  %v1490_v58 = vld [vmem:[#allocation8 + $0x1c0] ss:$16 sps:$4 sm:$0xff]   ;;  %v1492_v59 = vld [vmem:[#allocation8 + $0x1e4] ss:$16 sps:$4 sm:$0xff]  }
  0xa6   : > { %843 = vmatprep.subr.bf16.mxu1 %v1452_v23  ;;  %v1502_v60 = vld [vmem:[#allocation8 + $0x1a8] ss:$16 sps:$4 sm:$0xff]   ;;  %v1503_v61 = vld [vmem:[#allocation8 + $0x1cc] ss:$16 sps:$4 sm:$0xff]   ;;  %v1496_v62 = vld [vmem:[#allocation8 + $0x1e0] ss:$16 sps:$4 sm:$0xff]  }
  0xa7   : > { %v1505_v63 = vld [vmem:[#allocation8 + $0x1c8] ss:$16 sps:$4 sm:$0xff]   ;;  %v1506_v0 = vld [vmem:[#allocation8 + $0x1ec] ss:$16 sps:$4 sm:$0xff]   ;;  %v447_v5 = vsub.s32 0, %v446_v4  ;;  %v451_v7 = vsub.s32 1, %v446_v4 }
  0xa8   : > { %803 = vmatpush1.bf16.msra.mxu0 %v1436_v20  ;;  %v1508_v2 = vld [vmem:[#allocation8 + $0x1e8] ss:$16 sps:$4 sm:$0xff]   ;;  %v443_v6 = vld [vmem:[%s2166_s3] sm:$0xf]  ;;  %v459_v10 = vsub.s32 3, %v446_v4  ;;  %v455_v20 = vsub.s32 2, %v446_v4 }
  0xa9   : > { %804 = vmatprep.subr.bf16.mxu0 %v1438_v21  ;;  %844 = vmatpush1.bf16.msra.mxu1 %v1455_v26  ;;  %v448_v8 = vrot.slane %v443_v6, %v447_v5  ;;  %v452_v9 = vrot.slane %v443_v6, %v451_v7 }
  0xaa   : > { %845 = vmatprep.subr.bf16.mxu1 %v1458_v27  ;;  %v460_v18 = vrot.slane %v443_v6, %v459_v10 }
  0xac   : > { %805 = vmatpush1.bf16.msra.mxu0 %v1442_v24 }
  0xad   : > { %806 = vmatprep.subr.bf16.mxu0 %v1444_v25  ;;  %846 = vmatpush1.bf16.msra.mxu1 %v1461_v30  ;;  %v456_v25 = vrot.slane %v443_v6, %v455_v20 }
  0xae   : > { %847 = vmatprep.subr.bf16.mxu1 %v1464_v31 }
  0xb0   : > { %807 = vmatpush1.bf16.msra.mxu0 %v1448_v28 }
  0xb1   : > { %808 = vmatprep.subr.bf16.mxu0 %v1450_v29  ;;  %848 = vmatpush1.bf16.msra.mxu1 %v1467_v34 }
  0xb2   : > { %849 = vmatprep.subr.bf16.mxu1 %v1470_v35  ;;  %v893_v35 = vld [vmem:[#allocation6] sm:$0xff] }
  0xb4   : > { %809 = vmatpush1.bf16.msra.mxu0 %v1454_v32 }
  0xb5   : > { %810 = vmatprep.subr.bf16.mxu0 %v1456_v33  ;;  %850 = vmatpush1.bf16.msra.mxu1 %v1473_v38 }
  0xb6   : > { %851 = vmatprep.subr.bf16.mxu1 %v1476_v39 }
  0xb8   : > { %811 = vmatpush1.bf16.msra.mxu0 %v1460_v36 }
  0xb9   : > { %812 = vmatprep.subr.bf16.mxu0 %v1462_v37  ;;  %852 = vmatpush1.bf16.msra.mxu1 %v1479_v44 }
  0xba   : > { %853 = vmatprep.subr.bf16.mxu1 %v1482_v45 }
  0xbc   : > { %813 = vmatpush1.bf16.msra.mxu0 %v1466_v40 }
  0xbd   : > { %814 = vmatprep.subr.bf16.mxu0 %v1468_v42  ;;  %854 = vmatpush1.bf16.msra.mxu1 %v1485_v48 }
  0xbe   : > { %855 = vmatprep.subr.bf16.mxu1 %v1488_v49 }
  0xc0   : > { %815 = vmatpush1.bf16.msra.mxu0 %v1472_v46 }
  0xc1   : > { %816 = vmatprep.subr.bf16.mxu0 %v1474_v47  ;;  %856 = vmatpush1.bf16.msra.mxu1 %v1491_v52 }
  0xc2   : > { %857 = vmatprep.subr.bf16.mxu1 %v1494_v53 }
  0xc4   : > { %817 = vmatpush1.bf16.msra.mxu0 %v1478_v50 }
  0xc5   : > { %818 = vmatprep.subr.bf16.mxu0 %v1480_v51  ;;  %858 = vmatpush1.bf16.msra.mxu1 %v1497_v56 }
  0xc6   : > { %859 = vmatprep.subr.bf16.mxu1 %v1500_v57 }
  0xc8   : > { %819 = vmatpush1.bf16.msra.mxu0 %v1484_v54 }
  0xc9   : > { %820 = vmatprep.subr.bf16.mxu0 %v1486_v55  ;;  %860 = vmatpush1.bf16.msra.mxu1 %v1502_v60 }
  0xca   : > { %861 = vmatprep.subr.bf16.mxu1 %v1503_v61 }
  0xcc   : > { %821 = vmatpush1.bf16.msra.mxu0 %v1490_v58 }
  0xcd   : > { %822 = vmatprep.subr.bf16.mxu0 %v1492_v59  ;;  %862 = vmatpush1.bf16.msra.mxu1 %v1505_v63 }
  0xce   : > { %863 = vmatprep.subr.bf16.mxu1 %v1506_v0 }
  0xd0   : > { %823 = vmatpush1.bf16.msra.mxu0 %v1496_v62 }
  0xd1   : > { %864 = vmatpush1.bf16.msra.mxu1 %v1508_v2 }
  0xd3   : > { %825 = vmatmul.mubr.bf16.vlgmr.msra.gmra.mrb[0].mxu0 %v1198_v1 }
  0xd4   : > { %866 = vmatmul.mubr.bf16.vlgmr.msra.gmra.mrb[0].mxu1 %v1198_v1 }
 0x1a6   : > { %v826_v11 = vpop.f32.mrb[0].mxu0 }
 0x1a7   : > { %v827_v12 = vadd.f32 %v826_v11, %v448_v8  ;;  %v828_v13 = vpop.f32.mrb[1].mxu0  ;;  %v867_v21 = vpop.f32.mrb[0].mxu1 }
 0x1a8   : > { %v829_v14 = vadd.f32 %v828_v13, %v452_v9  ;;  %v830_v15 = vpop.f32.mrb[2].mxu0  ;;  %v869_v22 = vpop.f32.mrb[1].mxu1  ;;  %v868_v28 = vadd.f32 %v867_v21, %v456_v25 }
 0x1a9   : > { %v1264_v16 = vmul.f32 -1.442695, %v827_v12  ;;  %v831_v17 = vpop.f32.mrb[3].mxu0  ;;  %v870_v23 = vadd.f32 %v869_v22, %v460_v18  ;;  %v871_v24 = vpop.f32.mrb[2].mxu1 }
 0x1aa   : > { %v1265_v19 = vmul.f32 -1.442695, %v829_v14  ;;  %v872_v26 = vpop.f32.mrb[3].mxu1 }
 0x1ab   : > { %1509 = vpow2.f32 %v1264_v16  ;;  %v1266_v27 = vmul.f32 -1.442695, %v870_v23 }
 0x1ac   : > { %1511 = vpow2.f32 %v1265_v19 }
 0x1ad   : > { %1513 = vpow2.f32 %v1266_v27 }
 0x1ae   : > { %1515 = vtanh.f32 %v868_v28 }
 0x1b5   : > { %v1510_v29 = vpop.eup %1509 }
 0x1b6   : > { %v1512_v30 = vpop.eup %1511  ;;  %v877_v31 = vadd.f32 1.0, %v1510_v29 }
 0x1b7   : > { %v883_v32 = vadd.f32 1.0, %v1512_v30  ;;  %v1514_v33 = vpop.eup %1513 }
 0x1b8   : > { %1517 = vrcp.f32 %v877_v31  ;;  %v1516_v34 = vpop.eup %1515  ;;  %v890_v37 = vadd.f32 1.0, %v1514_v33 }
 0x1b9   : > { %1519 = vrcp.f32 %v883_v32 }
 0x1ba   : > { %1521 = vrcp.f32 %v890_v37 }
 0x1c2   : > { %v1518_v36 = vpop.eup %1517 }
 0x1c3   : > { %v1520_v38 = vpop.eup %1519  ;;  %v895_v39 = vmul.f32 %v1518_v36, %v1516_v34 }
 0x1c4   : > { %v894_v40 = vmul.f32 %v1520_v38, %v893_v35  ;;  %v1522_v42 = vpop.eup %1521 }
 0x1c6   : > { %v896_v41 = vadd.f32 %v895_v39, %v894_v40 }
 0x1c8   : > { %1523 = vtanh.f32 %v896_v41  ;;  %899 = vst [vmem:[#allocation14] sm:$0xff] %v896_v41 }
 0x1d2   : > { %v1524_v43 = vpop.eup %1523 }
 0x1d3   : > { %v898_v44 = vmul.f32 %v1524_v43, %v1522_v42 }
 0x1d5   : > { %900 = vst [vmem:[#allocation12] sm:$0xff] %v898_v44  ;;  %v901_v45 = vpack.c.bf16 %v898_v44, %v898_v44 }
 0x1d7   : > { %902 = vst [vmem:[#allocation2] sm:$0xf] %v901_v45 }
 0x1d8 PF: > { %v1525_v46 = vld [vmem:[%s2039_s26] sm:$0xff]   ;;  %v1788_v47 = vmov 0.0   ;;  %v1526_v48 = vld [vmem:[%s2039_s26 + $0x8] sm:$0xff]   ;;  %vm1789_vm0 = vmmov 0   ;;  %v1527_v49 = vld [vmem:[%s2039_s26 + $0x10] sm:$0xff]   ;;  %s1790_s20 = smov [#allocation12]  }
 0x1d9   : > { %1293 = vmatprep.subr.bf16.mxu0 %v1788_v47  ;;  %1309 = vmatprep.mubr.msk.bf16.mxu0 %vm1789_vm0, %v1788_v47  ;;  %v1528_v50 = vld [vmem:[%s2039_s26 + $0x18] sm:$0xff]   ;;  %v1529_v51 = vld [vmem:[%s2039_s26 + $0x20] sm:$0xff]   ;;  %v1530_v52 = vld [vmem:[%s2039_s26 + $0x28] sm:$0xff]   ;;  %s1041_s24 = sshll.u32 %s1790_s20, 4  ;;  %p2203_p0 = scmp.eq.s32.totalorder %s1859_s9, 2  ;;  %s1042_s24 = int_to_ptr.vmem [resolvable:$true] %s1041_s24 }
 0x1da   : > { %1294 = vmatpush3.bf16.msra.mxu0 %v1525_v46  ;;  %v1531_v53 = vld [vmem:[%s2039_s26 + $0x30] sm:$0xff]   ;;  %v1532_v54 = vld [vmem:[%s2039_s26 + $0x38] sm:$0xff]   ;;  %s1647_s21 = scalar_lea.vmem %s1042_s24, 128  ;;  %p1654_p11 = scmp.lt.s32.totalorder %s1042_s24, %s1042_s24 }
 0x1db   : > { %1295 = vmatprep.subr.bf16.mxu0 %v1788_v47  ;;  %p1648_p2 = scmp.ne.s32.totalorder %s1042_s24, %s1647_s21  ;;  %p1655_p12 = scmp.lt.s32.totalorder %s1647_s21, %s1647_s21 }
 0x1dd   : > { %p1649_p7 = pnand %p1648_p2, %p2203_p0  ;;  %p1656_p1 = por %p1655_p12, %p1654_p11 }
 0x1de   : > { %1296 = vmatpush3.bf16.msra.mxu0 %v1526_v48  ;;  %v903_v55 = vld [vmem:[#allocation2] sm:$0xf] }
 0x1df   : > { %1297 = vmatprep.subr.bf16.mxu0 %v1788_v47  ;;  %p1650_p8 = pneg %p1649_p7 }
 0x1e1   : > { %p1657_p6 = pnand %p1656_p1, %p1650_p8 }
 0x1e2   : > { %1298 = vmatpush3.bf16.msra.mxu0 %v1527_v49 }
 0x1e3   : > { %1299 = vmatprep.subr.bf16.mxu0 %v1788_v47 }
 0x1e6   : > { %1300 = vmatpush3.bf16.msra.mxu0 %v1528_v50 }
 0x1e7   : > { %1301 = vmatprep.subr.bf16.mxu0 %v1788_v47 }
 0x1ea   : > { %1302 = vmatpush3.bf16.msra.mxu0 %v1529_v51 }
 0x1eb   : > { %1303 = vmatprep.subr.bf16.mxu0 %v1788_v47 }
 0x1ee   : > { %1304 = vmatpush3.bf16.msra.mxu0 %v1530_v52 }
 0x1ef   : > { %1305 = vmatprep.subr.bf16.mxu0 %v1788_v47 }
 0x1f2   : > { %1306 = vmatpush3.bf16.msra.mxu0 %v1531_v53 }
 0x1f3   : > { %1307 = vmatprep.subr.bf16.mxu0 %v1788_v47 }
 0x1f6   : > { %1308 = vmatpush3.bf16.msra.mxu0 %v1532_v54 }
 0x1f9   : > { %1310 = vmatmul.mubr.bf16.vlgmr.msra.gmra.mrb[0].mxu0 %v903_v55 }
 0x1fa   : > { %1660 = shalt.err (!%p1657_p6)
}
 0x1fb   : > { %s1661_s19 = scalar_lea.hbm %s2170_s7, 128  ;;  %p2204_p3 = pmov %p2203_p0 }
 0x1fc   : > { %p1662_p13 = scmp.ne.s32.totalorder %s2170_s7, %s1661_s19  ;;  %p1667_p5 = scmp.lt.u32.totalorder %s1661_s19, %s2170_s7 }
 0x1fe   : > { %p1663_p4 = pnand %p1662_p13, %p2204_p3 }
 0x200   : > { %p1664_p9 = pneg %p1663_p4 }
 0x202   : > { %p1669_p10 = pnand %p1667_p5, %p1664_p9 }
 0x204   : > { %1672 = shalt.err (!%p1669_p10)
}
 0x205   : > { %p2205_p2 = pmov %p2203_p0  ;;  %s1791_s12 = smov [#allocation14]  }
 0x206   : > { %s1052_s20 = sshll.u32 %s1791_s12, 4  ;;  %s1053_s20 = int_to_ptr.vmem [resolvable:$true] %s1052_s20 }
 0x207   : > { %1329 = dma.vmem_to_hbm [thread:$0]  (%p2205_p2), %s1042_s24, 128, %s2170_s7, [#allocation13]  }
 0x208   : > { %s1673_s21 = scalar_lea.vmem %s1053_s20, 128  ;;  %p2206_p7 = pmov %p2205_p2 }
 0x209   : > { %p1674_p0 = scmp.ne.s32.totalorder %s1053_s20, %s1673_s21  ;;  %p1680_p12 = scmp.lt.s32.totalorder %s1053_s20, %s1053_s20 }
 0x20a   : > { %p1681_p1 = scmp.lt.s32.totalorder %s1673_s21, %s1673_s21 }
 0x20b   : > { %p1675_p8 = pnand %p1674_p0, %p2206_p7 }
 0x20c   : > { %p1682_p6 = por %p1681_p1, %p1680_p12 }
 0x20d   : > { %p1676_p11 = pneg %p1675_p8 }
 0x20f   : > { %p1683_p13 = pnand %p1682_p6, %p1676_p11 }
 0x211   : > { %1686 = shalt.err (!%p1683_p13)
}
 0x212   : > { %s1687_s19 = scalar_lea.hbm %s2171_s8, 128  ;;  %p2207_p4 = pmov %p2205_p2 }
 0x213   : > { %p1688_p3 = scmp.ne.s32.totalorder %s2171_s8, %s1687_s19  ;;  %p1693_p10 = scmp.lt.u32.totalorder %s1687_s19, %s2171_s8 }
 0x215   : > { %p1689_p9 = pnand %p1688_p3, %p2207_p4 }
 0x217   : > { %p1690_p5 = pneg %p1689_p9 }
 0x219   : > { %p1695_p2 = pnand %p1693_p10, %p1690_p5 }
 0x21b   : > { %1698 = shalt.err (!%p1695_p2)
}
 0x21c   : > { %p2208_p0 = pmov %p2207_p4  ;;  %v1267_v56 = vld [vmem:[%s372_s14] ss:$0 sm:$0xff]  ;;  %s1277_s21 = sshll.u32 %s1859_s9, 7 }
 0x21d   : > { %s1030_s18 = sshll.u32 %s2054_s15, 4  ;;  %s2115_s23 = scalar_lea.hbm %s2169_s6, %s1277_s21  ;;  %s2117_s18 = int_to_ptr.vmem [resolvable:$true] %s1030_s18 }
 0x21e   : > { %1331 = dma.vmem_to_hbm [thread:$0]  (%p2208_p0), %s1053_s20, 128, %s2171_s8, [#allocation13]  }
 0x21f   : > { %s1017_s22 = scalar_lea.sflag [#allocation5], %s2035_s11  ;;  %s1699_s14 = scalar_lea.vmem %s2117_s18, 128 }
 0x220   : > { %p1700_p7 = scmp.ne.s32.totalorder %s2117_s18, %s1699_s14  ;;  %p2209_p8 = scmp.ne.s32.totalorder %s2186_s17, 0 }
 0x221   : > { %s1792_s20 = smov [#allocation11]  }
 0x222   : > { %p1701_p11 = pnand %p1700_p7, %p2209_p8  ;;  %s1703_s24 = sshll.u32 %s1792_s20, 4  ;;  %s1704_s24 = int_to_ptr.vmem [resolvable:$false] %s1703_s24 }
 0x223   : > { %s1705_s26 = scalar_lea.vmem %s1704_s24, 256  ;;  %p1706_p1 = scmp.lt.s32.totalorder %s2117_s18, %s1704_s24 }
 0x224   : > { %p1702_p12 = pneg %p1701_p11  ;;  %p1707_p6 = scmp.lt.s32.totalorder %s1705_s26, %s1699_s14 }
 0x226   : > { %p1708_p13 = por %p1707_p6, %p1706_p1 }
 0x228   : > { %p1709_p3 = pnand %p1708_p13, %p1702_p12 }
 0x2cc   : > { %v1009_v57 = vpop.f32.mrb[0].mxu0 }
 0x2cd   : > { %v1010_v58 = vadd.f32 %v1267_v56, %v1009_v57  ;;  %v1311_v59 = vpop.f32.mrb[1].mxu0 }
 0x2ce   : > { %v1012_v60 = vpop.f32.mrb[2].mxu0 }
 0x2cf   : > { %1015 = vst [vmem:[%s2054_s15] sm:$0xff] %v1010_v58  ;;  %v1312_v61 = vpop.f32.mrb[3].mxu0 }
 0x2d0   : > { %1712 = shalt.err (!%p1709_p3)
}
 0x2d1   : > { %s1713_s11 = scalar_lea.hbm %s2115_s23, 128  ;;  %s1717_s1 = scalar_lea.hbm %s2169_s6, 384 }
 0x2d2   : > { %p1714_p4 = scmp.ne.s32.totalorder %s2115_s23, %s1713_s11  ;;  %p1718_p10 = scmp.lt.u32.totalorder %s2115_s23, %s2169_s6 }
 0x2d3   : > { %p1719_p2 = scmp.lt.u32.totalorder %s1717_s1, %s1713_s11  ;;  %p1721_p7 = scmp.lt.u32.totalorder %s1713_s11, %s2115_s23 }
 0x2d4   : > { %p1715_p9 = pnand %p1714_p4, %p2209_p8 }
 0x2d5   : > { %p1720_p0 = por %p1719_p2, %p1718_p10 }
 0x2d6   : > { %p1716_p5 = pneg %p1715_p9 }
 0x2d7   : > { %p1722_p11 = por %p1721_p7, %p1720_p0 }
 0x2d9   : > { %p1723_p12 = pnand %p1722_p11, %p1716_p5 }
 0x2db   : > { %1726 = shalt.err (!%p1723_p12)
}
 0x2dc   : > { %1327 = dma.vmem_to_hbm [thread:$0]  (%p2209_p8), %s2117_s18, 128, %s2115_s23, %s1017_s22  }
 0x2dd   : > { %p2210_p1 = scmp.eq.s32.totalorder %s1859_s9, 2 }
 0x2df   : > { %1756 = dma.done.wait (%p2210_p1), [#allocation13], 256   ;;  %p2211_p6 = pmov %p2210_p1 }
 0x2e1   : > { %1758 = vsyncadd (%p2211_p6), [#allocation13], 4294967040 }
 0x2e2 PF: > { %s2212_s12 = sld [smem:[#allocation22_spill]]  ;;  %p1366_p13 = scmp.ge.s32.totalorder %s1777_s30, 2 }
 0x2e3   : > { %s1072_s21 = sand.u32 1, %s1765_s27  }
 0x2e4   : > { %s1073_s13 = scalar_lea.sflag [#allocation5], %s1072_s21 }
 0x2e8   : > { %p2213_p3 = scmp.ne.s32.totalorder %s2212_s12, 0 }
 0x2ea   : > { %p1352_p4 = pnand %p1366_p13, %p2213_p3 }
 0x2ec   : > { %1760 = dma.done.wait (!%p1352_p4), %s1073_s13, 128  }
 0x2ed   : > { %1762 = vsyncadd (!%p1352_p4), %s1073_s13, 4294967168  ;;  %s2214_s30 = sld [smem:[#allocation20_spill]]  ;;  %s2215_s17 = sld [smem:[#allocation21_spill]] }
 0x2ee   : > { %s2216_s27 = smov %s1769_s28  ;;  %s2217_s28 = smov %s1773_s29 }
 0x2f3   : > { %p25_p8 = scmp.ge.s32.totalorder %s2214_s30, 5   ;;  %s2218_s29 = smov %s2215_s17 }
 0x2f5   :  { %27 = sbr.rel (!%p25_p8) target bundleno = 10 (0xa), region = 125 }
 0x2fc   :  { %1078 = vsyncpa [#allocation4], 1 }
 0x2fd   :  { %1080 = vsyncpa [#allocation4 + $0x1], 1 }
 0x2fe   :  { %1081 = vsyncpa [#allocation7], 1 }
 0x2ff   :  { %1082 = vsyncpa [#allocation10], 1 }
 0x300   :  { %1084 = vsyncpa [#allocation10 + $0x1], 1 }
 0x301   :  { %1085 = vsyncpa [#allocation5], 1 }
 0x302   :  { %1087 = vsyncpa [#allocation5 + $0x1], 1 }
 0x303   :  { %1088 = vsyncpa [#allocation13], 1 }

</bundles_post_ra>
